<compile_context>
chip_gen: v6e
topology: v6e:2x2x1
jax: 0.10.0
libtpu: 0.0.40
codegen_flags: <defaults>
</compile_context>

<pallas_src>
import functools

import jax
import jax.numpy as jnp
from jax.experimental import pallas as pl
from jax.experimental.pallas import tpu as pltpu


def _critic_kernel(state_ref, action_ref, w1s_ref, w1a_ref, b1_ref,
                   w2_ref, b2_ref, w3_ref, b3_ref, out_ref):
    s = state_ref[...]
    a = action_ref[...]

    # fc1 (fused concat: x @ W1 == state @ W1_s + action @ W1_a) + ReLU  -> MXU
    h1 = (jnp.dot(s, w1s_ref[...], preferred_element_type=jnp.float32)
          + jnp.dot(a, w1a_ref[...], preferred_element_type=jnp.float32)
          + b1_ref[...])
    h1 = jnp.maximum(h1, 0.0)

    # fc2 + ReLU  -> MXU
    h2 = jnp.dot(h1, w2_ref[...], preferred_element_type=jnp.float32) + b2_ref[...]
    h2 = jnp.maximum(h2, 0.0)

    # fc3 (out_features=1): lane-sparse on the MXU, so do it on the VPU/XLU:
    # (TB,64) * (1,64) -> reduce over lanes -> (TB,1)
    y = jnp.sum(h2 * w3_ref[...], axis=-1, keepdims=True) + b3_ref[...]
    out_ref[...] = y.astype(out_ref.dtype)


def _round_up(x, m):
    return ((x + m - 1) // m) * m


@functools.partial(jax.jit, static_argnames=("tb",))
def critic_forward(state, action, params, *, tb=1024):
    """Pallas equivalent of Critic.forward(state, action)."""
    B, state_size = state.shape
    action_size = action.shape[1]
    in_dim = state_size + action_size

    w1s, w1a, b1 = params["w1_s"], params["w1_a"], params["b1"]
    w2, b2 = params["w2"], params["b2"]
    w3, b3 = params["w3_row"], params["b3"]          # w3_row: (1, 64), b3: (1, 1)

    # Batch tiling: small batches run as one full-extent tile (no padding needed,
    # full-array blocks are exempt from the (8,128) rule); large batches are
    # padded to a multiple of TB (TB multiple of 256 for MXU height).
    if B <= tb:
        TB, B_pad = B, B
    else:
        TB = tb
        B_pad = _round_up(B, TB)
        pad = B_pad - B
        state = jnp.pad(state, ((0, pad), (0, 0)))
        action = jnp.pad(action, ((0, pad), (0, 0)))

    grid = (pl.cdiv(B_pad, TB),)

    act_spec = lambda f: pl.BlockSpec((TB, f), lambda i: (i, 0))
    res_spec = lambda shape: pl.BlockSpec(shape, lambda i: (0, 0))  # VMEM-resident

    flops = 2 * B_pad * (in_dim * 64 + 64 * 64 + 64)
    param_bytes = 4 * (in_dim * 64 + 64 + 64 * 64 + 64 + 64 + 1)
    bytes_accessed = 4 * B_pad * (in_dim + 1) + param_bytes

    out = pl.pallas_call(
        _critic_kernel,
        out_shape=jax.ShapeDtypeStruct((B_pad, 1), jnp.float32),
        grid=grid,
        in_specs=[
            act_spec(state_size),            # state tile
            act_spec(action_size),           # action tile
            res_spec(w1s.shape), res_spec(w1a.shape), res_spec(b1.shape),
            res_spec(w2.shape), res_spec(b2.shape),
            res_spec(w3.shape), res_spec(b3.shape),
        ],
        out_specs=act_spec(1),
        compiler_params=pltpu.CompilerParams(
            dimension_semantics=("parallel",)),
        cost_estimate=pl.CostEstimate(
            flops=flops, transcendentals=0, bytes_accessed=bytes_accessed),
    )(state, action, w1s, w1a, b1, w2, b2, w3, b3)

    return out[:B] if B_pad != B else out


def init_critic_params(key, state_size, action_size):
    """Init mirroring nn.Linear default (uniform +-1/sqrt(fan_in)).

    Weights stored as (in_features, out_features) = PyTorch weight.T;
    w1 is pre-split into the state/action halves; w3 is stored as a row.
    """
    def linear(key, fan_in, fan_out):
        kw, kb = jax.random.split(key)
        bound = 1.0 / jnp.sqrt(fan_in)
        w = jax.random.uniform(kw, (fan_in, fan_out), jnp.float32, -bound, bound)
        b = jax.random.uniform(kb, (1, fan_out), jnp.float32, -bound, bound)
        return w, b

    k1, k2, k3 = jax.random.split(key, 3)
    in_dim = state_size + action_size
    w1, b1 = linear(k1, in_dim, 64)
    w2, b2 = linear(k2, 64, 64)
    w3, b3 = linear(k3, 64, 1)
    return {
        "w1_s": w1[:state_size],          # (state_size, 64)
        "w1_a": w1[state_size:],          # (action_size, 64)
        "b1": b1,                         # (1, 64)
        "w2": w2, "b2": b2,               # (64, 64), (1, 64)
        "w3_row": w3.T,                   # (1, 64)
        "b3": b3.reshape(1, 1),           # (1, 1)
    }


def _reference(state, action, params):
    x = jnp.concatenate([state, action], axis=1)
    w1 = jnp.concatenate([params["w1_s"], params["w1_a"]], axis=0)
    h = jnp.maximum(x @ w1 + params["b1"], 0.0)
    h = jnp.maximum(h @ params["w2"] + params["b2"], 0.0)
    return h @ params["w3_row"].T + params["b3"]


if __name__ == "__main__":
    state_size, action_size, batch = 8, 4, 2

    key = jax.random.PRNGKey(0)
    k_params, k_state, k_action, k_state2, k_action2 = jax.random.split(key, 5)

    params = init_critic_params(k_params, state_size, action_size)

    # Small batch (single full-extent tile path).
    state = jax.random.normal(k_state, (batch, state_size), jnp.float32)
    action = jax.random.normal(k_action, (batch, action_size), jnp.float32)
    q = jax.block_until_ready(critic_forward(state, action, params))
    ref = _reference(state, action, params)
    assert q.shape == (batch, 1)
    assert jnp.allclose(q, ref, atol=1e-5, rtol=1e-5)

    # Larger batch (exercises the tiled/padded grid path).
    big_b = 1500
    state2 = jax.random.normal(k_state2, (big_b, state_size), jnp.float32)
    action2 = jax.random.normal(k_action2, (big_b, action_size), jnp.float32)
    q2 = jax.block_until_ready(critic_forward(state2, action2, params))
    ref2 = _reference(state2, action2, params)
    assert q2.shape == (big_b, 1)
    assert jnp.allclose(q2, ref2, atol=1e-5, rtol=1e-5)

    print("KERNEL_OK")
</pallas_src>

<mosaic_0001>
module attributes {stable_mosaic.version = 11 : i64} {
  func.func @_critic_kernel(%arg0: i32, %arg1: memref<2x8xf32, #tpu.memory_space<vmem>>, %arg2: memref<2x4xf32, #tpu.memory_space<vmem>>, %arg3: memref<8x64xf32, #tpu.memory_space<vmem>>, %arg4: memref<4x64xf32, #tpu.memory_space<vmem>>, %arg5: memref<1x64xf32, #tpu.memory_space<vmem>>, %arg6: memref<64x64xf32, #tpu.memory_space<vmem>>, %arg7: memref<1x64xf32, #tpu.memory_space<vmem>>, %arg8: memref<1x64xf32, #tpu.memory_space<vmem>>, %arg9: memref<1x1xf32, #tpu.memory_space<vmem>>, %arg10: memref<2x1xf32, #tpu.memory_space<vmem>>) attributes {dimension_semantics = [#tpu.dimension_semantics<parallel>], iteration_bounds = array<i64: 1>, scalar_prefetch = 0 : i64, scratch_operands = 0 : i64, tpu.core_type = #tpu.core_type<tc>, window_params = [{transform_indices = @transform_0, window_bounds = array<i64: 2, 8>}, {transform_indices = @transform_1, window_bounds = array<i64: 2, 4>}, {pipeline_mode = #tpu.pipeline_mode<synchronous>, transform_indices = @transform_2, window_bounds = array<i64: 8, 64>}, {pipeline_mode = #tpu.pipeline_mode<synchronous>, transform_indices = @transform_3, window_bounds = array<i64: 4, 64>}, {pipeline_mode = #tpu.pipeline_mode<synchronous>, transform_indices = @transform_4, window_bounds = array<i64: 1, 64>}, {pipeline_mode = #tpu.pipeline_mode<synchronous>, transform_indices = @transform_5, window_bounds = array<i64: 64, 64>}, {pipeline_mode = #tpu.pipeline_mode<synchronous>, transform_indices = @transform_6, window_bounds = array<i64: 1, 64>}, {pipeline_mode = #tpu.pipeline_mode<synchronous>, transform_indices = @transform_7, window_bounds = array<i64: 1, 64>}, {pipeline_mode = #tpu.pipeline_mode<synchronous>, transform_indices = @transform_8, window_bounds = array<i64: 1, 1>}, {transform_indices = @transform_9, window_bounds = array<i64: 2, 1>}]} {
    %c0 = arith.constant 0 : index
    %c0_0 = arith.constant 0 : index
    %0 = vector.load %arg1[%c0, %c0_0] : memref<2x8xf32, #tpu.memory_space<vmem>>, vector<2x8xf32>
    %c0_1 = arith.constant 0 : index
    %c0_2 = arith.constant 0 : index
    %1 = vector.load %arg2[%c0_1, %c0_2] : memref<2x4xf32, #tpu.memory_space<vmem>>, vector<2x4xf32>
    %c0_3 = arith.constant 0 : index
    %c0_4 = arith.constant 0 : index
    %2 = vector.load %arg3[%c0_3, %c0_4] : memref<8x64xf32, #tpu.memory_space<vmem>>, vector<8x64xf32>
    %cst = arith.constant dense<0.000000e+00> : vector<2x64xf32>
    %3 = tpu.matmul %0, %2, %cst {dimension_numbers = #tpu.dot_dimension_numbers<[1], [0], [0], [1], [0, 0, 1, 1], [], []>} : vector<2x8xf32>, vector<8x64xf32>, vector<2x64xf32> -> vector<2x64xf32>
    %c0_5 = arith.constant 0 : index
    %c0_6 = arith.constant 0 : index
    %4 = vector.load %arg4[%c0_5, %c0_6] : memref<4x64xf32, #tpu.memory_space<vmem>>, vector<4x64xf32>
    %cst_7 = arith.constant dense<0.000000e+00> : vector<2x64xf32>
    %5 = tpu.matmul %1, %4, %cst_7 {dimension_numbers = #tpu.dot_dimension_numbers<[1], [0], [0], [1], [0, 0, 1, 1], [], []>} : vector<2x4xf32>, vector<4x64xf32>, vector<2x64xf32> -> vector<2x64xf32>
    %6 = arith.addf %3, %5 : vector<2x64xf32>
    %c0_8 = arith.constant 0 : index
    %c0_9 = arith.constant 0 : index
    %7 = vector.load %arg5[%c0_8, %c0_9] : memref<1x64xf32, #tpu.memory_space<vmem>>, vector<1x64xf32>
    %8 = vector.broadcast %7 : vector<1x64xf32> to vector<2x64xf32>
    %9 = arith.addf %6, %8 : vector<2x64xf32>
    %cst_10 = arith.constant 0.000000e+00 : f32
    %10 = vector.broadcast %cst_10 : f32 to vector<2x64xf32>
    %11 = arith.maximumf %9, %10 : vector<2x64xf32>
    %c0_11 = arith.constant 0 : index
    %c0_12 = arith.constant 0 : index
    %12 = vector.load %arg6[%c0_11, %c0_12] : memref<64x64xf32, #tpu.memory_space<vmem>>, vector<64x64xf32>
    %cst_13 = arith.constant dense<0.000000e+00> : vector<2x64xf32>
    %13 = tpu.matmul %11, %12, %cst_13 {dimension_numbers = #tpu.dot_dimension_numbers<[1], [0], [0], [1], [0, 0, 1, 1], [], []>} : vector<2x64xf32>, vector<64x64xf32>, vector<2x64xf32> -> vector<2x64xf32>
    %c0_14 = arith.constant 0 : index
    %c0_15 = arith.constant 0 : index
    %14 = vector.load %arg7[%c0_14, %c0_15] : memref<1x64xf32, #tpu.memory_space<vmem>>, vector<1x64xf32>
    %15 = vector.broadcast %14 : vector<1x64xf32> to vector<2x64xf32>
    %16 = arith.addf %13, %15 : vector<2x64xf32>
    %cst_16 = arith.constant 0.000000e+00 : f32
    %17 = vector.broadcast %cst_16 : f32 to vector<2x64xf32>
    %18 = arith.maximumf %16, %17 : vector<2x64xf32>
    %c0_17 = arith.constant 0 : index
    %c0_18 = arith.constant 0 : index
    %19 = vector.load %arg8[%c0_17, %c0_18] : memref<1x64xf32, #tpu.memory_space<vmem>>, vector<1x64xf32>
    %20 = vector.broadcast %19 : vector<1x64xf32> to vector<2x64xf32>
    %21 = arith.mulf %18, %20 : vector<2x64xf32>
    %cst_19 = arith.constant dense<0.000000e+00> : vector<2xf32>
    %22 = vector.multi_reduction <add>, %21, %cst_19 [1] : vector<2x64xf32> to vector<2xf32>
    %23 = vector.shape_cast %22 : vector<2xf32> to vector<2x1xf32>
    %c0_20 = arith.constant 0 : index
    %c0_21 = arith.constant 0 : index
    %24 = vector.load %arg9[%c0_20, %c0_21] : memref<1x1xf32, #tpu.memory_space<vmem>>, vector<1x1xf32>
    %25 = vector.broadcast %24 : vector<1x1xf32> to vector<2x1xf32>
    %26 = arith.addf %23, %25 : vector<2x1xf32>
    %c0_22 = arith.constant 0 : index
    %c0_23 = arith.constant 0 : index
    %27 = vector.load %arg10[%c0_22, %c0_23] : memref<2x1xf32, #tpu.memory_space<vmem>>, vector<2x1xf32>
    tpu.vector_store %arg10[%c0_22, %c0_23], %26 {strides = array<i32>} : memref<2x1xf32, #tpu.memory_space<vmem>>, vector<2x1xf32>,
    return
  }
  func.func @transform_0(%arg0: i32) -> (i32, i32) {
    %c0_i32 = arith.constant 0 : i32
    %c0_i32_0 = arith.constant 0 : i32
    return %arg0, %c0_i32 : i32, i32
  }
  func.func @transform_1(%arg0: i32) -> (i32, i32) {
    %c0_i32 = arith.constant 0 : i32
    %c0_i32_0 = arith.constant 0 : i32
    return %arg0, %c0_i32 : i32, i32
  }
  func.func @transform_2(%arg0: i32) -> (i32, i32) {
    %c0_i32 = arith.constant 0 : i32
    %c0_i32_0 = arith.constant 0 : i32
    %c0_i32_1 = arith.constant 0 : i32
    return %c0_i32, %c0_i32_0 : i32, i32
  }
  func.func @transform_3(%arg0: i32) -> (i32, i32) {
    %c0_i32 = arith.constant 0 : i32
    %c0_i32_0 = arith.constant 0 : i32
    %c0_i32_1 = arith.constant 0 : i32
    return %c0_i32, %c0_i32_0 : i32, i32
  }
  func.func @transform_4(%arg0: i32) -> (i32, i32) {
    %c0_i32 = arith.constant 0 : i32
    %c0_i32_0 = arith.constant 0 : i32
    %c0_i32_1 = arith.constant 0 : i32
    return %c0_i32, %c0_i32_0 : i32, i32
  }
  func.func @transform_5(%arg0: i32) -> (i32, i32) {
    %c0_i32 = arith.constant 0 : i32
    %c0_i32_0 = arith.constant 0 : i32
    %c0_i32_1 = arith.constant 0 : i32
    return %c0_i32, %c0_i32_0 : i32, i32
  }
  func.func @transform_6(%arg0: i32) -> (i32, i32) {
    %c0_i32 = arith.constant 0 : i32
    %c0_i32_0 = arith.constant 0 : i32
    %c0_i32_1 = arith.constant 0 : i32
    return %c0_i32, %c0_i32_0 : i32, i32
  }
  func.func @transform_7(%arg0: i32) -> (i32, i32) {
    %c0_i32 = arith.constant 0 : i32
    %c0_i32_0 = arith.constant 0 : i32
    %c0_i32_1 = arith.constant 0 : i32
    return %c0_i32, %c0_i32_0 : i32, i32
  }
  func.func @transform_8(%arg0: i32) -> (i32, i32) {
    %c0_i32 = arith.constant 0 : i32
    %c0_i32_0 = arith.constant 0 : i32
    %c0_i32_1 = arith.constant 0 : i32
    return %c0_i32, %c0_i32_0 : i32, i32
  }
  func.func @transform_9(%arg0: i32) -> (i32, i32) {
    %c0_i32 = arith.constant 0 : i32
    %c0_i32_0 = arith.constant 0 : i32
    return %arg0, %c0_i32 : i32, i32
  }
}

</mosaic_0001>

<bundles_post_ra>
// kernel: critic_forward.1
= control target key start
LH: loop header
LB: loop body
LE: loop exit
PB: predicated region body
PF: predicated region fallthrough
CT: control target
= control target key end

     0   :  { %s599_s0 = inlined_call_operand.vmem [shape: f32[2,8], index: 0, kind: input, shape index: {}]   ;;  %s600_s1 = inlined_call_operand.hbm [shape: f32[2,4], index: 1, kind: input, shape index: {}]   ;;  %s601_s2 = inlined_call_operand.vmem [shape: f32[8,64], index: 2, kind: input, shape index: {}]   ;;  %s602_s3 = inlined_call_operand.hbm [shape: f32[4,64], index: 3, kind: input, shape index: {}]   ;;  %s603_s4 = inlined_call_operand.vmem [shape: f32[1,64], index: 4, kind: input, shape index: {}]   ;;  %s604_s5 = inlined_call_operand.hbm [shape: f32[64,64], index: 5, kind: input, shape index: {}]   ;;  %s605_s6 = inlined_call_operand.hbm [shape: f32[1,64], index: 6, kind: input, shape index: {}]   ;;  %s606_s7 = inlined_call_operand.vmem [shape: f32[1,64], index: 7, kind: input, shape index: {}]   ;;  %s607_s8 = inlined_call_operand.<no memory space> [shape: f32[1,1], index: 8, kind: input, shape index: {}]   ;;  %s608_s9 = inlined_call_operand.vmem [shape: f32[2,1], index: 9, kind: output, shape index: {}]  }
   0x1   :  { %v14_v0 = vstv %s607_s8 }
   0x2   :  { %15 = vst [vmem:[#allocation2] sm:$0x1] %v14_v0 }
   0x3   :  { %16 = vsyncpa [#allocation4], 0 }
   0x4   :  { %17 = vsyncpa [#allocation6], 0 }
   0x5   :  { %18 = vsyncpa [#allocation9], 0  ;;  %s511_s11 = smov [#allocation5]   ;;  %s512_s13 = smov [#allocation3]  }
   0x6   :  { %s39_s12 = sshll.u32 %s511_s11, 4  ;;  %s27_s14 = sshll.u32 %s512_s13, 4  ;;  %s40_s12 = int_to_ptr.vmem [resolvable:$true] %s39_s12  ;;  %s28_s14 = int_to_ptr.vmem [resolvable:$true] %s27_s14 }
   0x7   :  { %s433_s15 = scalar_lea.vmem %s40_s12, 64  ;;  %p438_p1 = scmp.lt.s32.totalorder %s40_s12, %s40_s12 }
   0x8   :  { %p434_p0 = scmp.ne.s32.totalorder %s40_s12, %s433_s15  ;;  %p439_p2 = scmp.lt.s32.totalorder %s433_s15, %s433_s15 }
   0xa   :  { %p440_p3 = por %p439_p2, %p438_p1 }
   0xc   :  { %p441_p4 = pnand %p440_p3, %p434_p0 }
   0xe   :  { %444 = shalt.err (!%p441_p4)
}
   0xf   :  { %42 = dma.hbm_to_vmem [thread:$0]  %s602_s3, 64, %s40_s12, [#allocation6]  }
  0x10   :  { %s453_s8 = scalar_lea.vmem %s28_s14, 32  ;;  %p458_p6 = scmp.lt.s32.totalorder %s28_s14, %s28_s14 }
  0x11   :  { %p454_p5 = scmp.ne.s32.totalorder %s28_s14, %s453_s8  ;;  %p459_p7 = scmp.lt.s32.totalorder %s453_s8, %s453_s8 }
  0x13   :  { %p460_p8 = por %p459_p7, %p458_p6 }
  0x15   :  { %p461_p9 = pnand %p460_p8, %p454_p5 }
  0x17   :  { %464 = shalt.err (!%p461_p9)
}
  0x18   :  { %30 = dma.hbm_to_vmem [thread:$0]  %s600_s1, 32, %s28_s14, [#allocation4]  }
  0x19   :  { %s513_s20 = smov [#allocation7]  }
  0x1a   :  { %s50_s21 = sshll.u32 %s513_s20, 4  ;;  %s51_s21 = int_to_ptr.vmem [resolvable:$true] %s50_s21 }
  0x1b   :  { %s473_s22 = scalar_lea.vmem %s51_s21, 1024  ;;  %p478_p11 = scmp.lt.s32.totalorder %s51_s21, %s51_s21 }
  0x1c   :  { %p474_p10 = scmp.ne.s32.totalorder %s51_s21, %s473_s22  ;;  %p479_p12 = scmp.lt.s32.totalorder %s473_s22, %s473_s22 }
  0x1e   :  { %p480_p13 = por %p479_p12, %p478_p11 }
  0x20   :  { %p481_p0 = pnand %p480_p13, %p474_p10 }
  0x22   :  { %484 = shalt.err (!%p481_p0)
}
  0x23   :  { %s514_s3 = smov 128   ;;  %s515_s23 = smov 8  }
  0x24   :  { %56 = dma.hbm_to_vmem [thread:$0]  %s604_s5, 1024, %s51_s21, [#allocation6], %s514_s3, %s514_s3, %s515_s23  }
  0x25   :  { %s516_s26 = smov [#allocation8]  }
  0x26   :  { %s63_s27 = sshll.u32 %s516_s26, 4  ;;  %s64_s27 = int_to_ptr.vmem [resolvable:$true] %s63_s27 }
  0x27   :  { %s493_s1 = scalar_lea.vmem %s64_s27, 16  ;;  %s497_s28 = scalar_lea.vmem %s64_s27, 32 }
  0x28   :  { %p494_p1 = scmp.ne.s32.totalorder %s64_s27, %s493_s1  ;;  %p498_p2 = scmp.lt.s32.totalorder %s64_s27, %s64_s27 }
  0x29   :  { %p499_p3 = scmp.lt.s32.totalorder %s497_s28, %s493_s1 }
  0x2b   :  { %p500_p4 = por %p499_p3, %p498_p2 }
  0x2d   :  { %p501_p5 = pnand %p500_p4, %p494_p1 }
  0x2f   :  { %504 = shalt.err (!%p501_p5)
}
  0x30   :  { %66 = dma.hbm_to_vmem [thread:$0]  %s605_s6, 16, %s64_s27, [#allocation9]  }
  0x31   :  { %505 = dma.done.wait [#allocation4], 32  }
  0x32   :  { %506 = vsyncadd [#allocation4], 4294967264 }
  0x33   :  { %507 = dma.done.wait [#allocation6], 1088  }
  0x34   :  { %508 = vsyncadd [#allocation6], 4294966208 }
  0x35   :  { %509 = dma.done.wait [#allocation9], 16  }
  0x36   :  { %510 = vsyncadd [#allocation9], 4294967280  ;;  %v517_v1 = vmov 0.0   ;;  %vm518_vm0 = vmmov 0   ;;  %vm91_vm1 = vcmask 1043456   ;;  %vm87_vm2 = vcmask 31744  }
  0x37   :  { %388 = vmatprep.subr.mxu1 %v517_v1  ;;  %390 = vmatprep.mubr.msk.f32.mxu1 %vm518_vm0, %v517_v1  ;;  %v86_v2 = vld [vmem:[#allocation5] sm:$0xf]  ;;  %v84_v3 = vld [vmem:[#allocation3] sm:$0x3]  ;;  %vm165_vm3 = vcmask 64512   ;;  %v254_v7 = vld [vmem:[#allocation7 + $0x30] sm:$0xff] }
  0x38   :  { %398 = vmatprep.subr.mxu0 %v517_v1  ;;  %414 = vmatprep.mubr.msk.f32.mxu0 %vm518_vm0, %v517_v1  ;;  %v85_v4 = vld [vmem:[%s601_s2] sm:$0xff]  ;;  %v253_v8 = vld [vmem:[#allocation7 + $0x28] sm:$0xff]  ;;  %v250_v11 = vld [vmem:[#allocation7 + $0x10] sm:$0xff]  ;;  %vm263_vm4 = vcmask 523264   ;;  %vm346_vm5 = vcmask 517120   ;;  %vm358_vm6 = vcmask 1024  }
  0x39   :  { %389 = vmatpush3.msk.msra.mxu1 %vm91_vm1, %v86_v2  ;;  %v255_v5 = vld [vmem:[#allocation7 + $0x38] sm:$0xff]  ;;  %v252_v9 = vld [vmem:[#allocation7 + $0x20] sm:$0xff]  ;;  %v249_v12 = vld [vmem:[#allocation7 + $0x8] sm:$0xff] }
  0x3a   :  { %391 = vmatmul.mubr.msk.f32.vlgmr.msra.gmra.mxu1 %vm87_vm2, %v84_v3  ;;  %393 = vmatprep.subr.mxu1 %v517_v1  ;;  %v83_v6 = vld [vmem:[%s599_s0] sm:$0x3]  ;;  %v248_v13 = vld [vmem:[#allocation7] sm:$0xff] }
  0x3b   :  { %394 = vmatpush3.msra.mxu1 %v85_v4  ;;  %395 = vmatprep.mubr.msk.f32.mxu1 %vm518_vm0, %v517_v1  ;;  %v251_v10 = vld [vmem:[#allocation7 + $0x18] sm:$0xff]  ;;  %v371_v22 = vld [vmem:[#allocation8] ss:$0 sm:$0xff] }
  0x3c   :  { %399 = vmatpush3.msra.mxu0 %v255_v5  ;;  %v370_v17 = vld [vmem:[%s603_s4] ss:$0 sm:$0xff] }
  0x3d   :  { %400 = vmatprep.subr.mxu0 %v517_v1  ;;  %v373_v26 = vld [vmem:[%s606_s7] ss:$0 sm:$0xff] }
  0x3e   :  { %396 = vmatmul.mubr.msk.f32.vlgmr.msra.gmra.mxu1 %vm165_vm3, %v83_v6  ;;  %401 = vmatpush3.msra.mxu0 %v254_v7  ;;  %v374_v30 = vld [vmem:[#allocation2] ss:$0 sm:$0xff] }
  0x3f   :  { %402 = vmatprep.subr.mxu0 %v517_v1 }
  0x40   :  { %403 = vmatpush3.msra.mxu0 %v253_v8 }
  0x41   :  { %404 = vmatprep.subr.mxu0 %v517_v1 }
  0x42   :  { %405 = vmatpush3.msra.mxu0 %v252_v9 }
  0x43   :  { %406 = vmatprep.subr.mxu0 %v517_v1 }
  0x44   :  { %407 = vmatpush3.msra.mxu0 %v251_v10 }
  0x45   :  { %408 = vmatprep.subr.mxu0 %v517_v1 }
  0x46   :  { %409 = vmatpush3.msra.mxu0 %v250_v11 }
  0x47   :  { %410 = vmatprep.subr.mxu0 %v517_v1 }
  0x48   :  { %411 = vmatpush3.msra.mxu0 %v249_v12 }
  0x49   :  { %412 = vmatprep.subr.mxu0 %v517_v1 }
  0x4a   :  { %413 = vmatpush3.msra.mxu0 %v248_v13 }
  0xfa   :  { %v161_v14 = vpop.f32.mrf.mxu1 }
  0xfc   :  { %v392_v15 = vpop.f32.mrf.mxu1 }
  0xfe   :  { %v235_v16 = vpop.f32.mrf.mxu1 }
  0xff   :  { %v236_v18 = vadd.f32 %v235_v16, %v161_v14 }
 0x100   :  { %v397_v19 = vpop.f32.mrf.mxu1 }
 0x101   :  { %v246_v20 = vadd.f32 %v370_v17, %v236_v18 }
 0x103   :  { %v247_v21 = vmax.f32 %v246_v20, 0.0 }
 0x105   :  { %415 = vmatmul.mubr.msk.f32.vlgmr.msra.gmra.mxu0 %vm263_vm4, %v247_v21 }
 0x1c5   :  { %v333_v23 = vpop.f32.mrf.mxu0 }
 0x1c6   :  { %v334_v24 = vadd.f32 %v371_v22, %v333_v23 }
 0x1c7   :  { %v416_v25 = vpop.f32.mrf.mxu0 }
 0x1c8   :  { %v337_v27 = vmax.f32 %v334_v24, 0.0 }
 0x1ca   :  { %v345_v28 = vmul.f32 %v373_v26, %v337_v27 }
 0x1cc   :  { %v347_v29 = vsel %vm346_vm5, %v345_v28, 0.0 }
 0x1cd   :  { %348 = vadd.xlane.f32.xlu0 %v347_v29 }
 0x256   :  { %v349_v31 = vpop.xlane.xlu0 %348 }
 0x257   :  { %v357_v32 = vadd.f32 %v374_v30, %v349_v31 }
 0x259   :  { %359 = vst.msk [vmem:[%s608_s9] sm:$0x3] %vm358_vm6, %v357_v32 }
 0x25a   :  { %364 = vsyncpa [#allocation4], 1 }
 0x25b   :  { %365 = vsyncpa [#allocation6], 1 }
 0x25c   :  { %366 = vsyncpa [#allocation9], 1 }

</bundles_post_ra>
